<compile_context>
chip_gen: v7x
topology: tpu7x:2x2x1
jax: 0.10.0
libtpu: 0.0.40
codegen_flags: <defaults>
</compile_context>

<pallas_src>
from functools import partial
from typing import NamedTuple

import jax
import jax.numpy as jnp
from jax.experimental import pallas as pl
from jax.experimental.pallas import tpu as pltpu

LANE = 128


def _round_up(x, m):
    return ((x + m - 1) // m) * m


class Meta(NamedTuple):
    d_in: int
    d_in_p: int
    h_p: int
    d_out: int
    d_out_p: int
    num_hidden: int


# ----------------------------------------------------------------------------
# Kernel: one batch tile through the whole MLP (BN already folded into w_in).
# ----------------------------------------------------------------------------
def simple_nn_kernel(*refs, num_hidden):
    if num_hidden > 0:
        (x_ref, w_in_ref, b_in_ref, w_hid_ref, b_hid_ref,
         w_out_ref, b_out_ref, o_ref) = refs
    else:
        x_ref, w_in_ref, b_in_ref, w_out_ref, b_out_ref, o_ref = refs

    # x may arrive f32 (aligned fast path) or bf16 (padded path); the cast is a
    # VPU op hidden under the MXU either way.
    h = jnp.dot(x_ref[...].astype(w_in_ref.dtype), w_in_ref[...],
                preferred_element_type=jnp.float32)
    h = jnp.maximum(h + b_in_ref[...], 0.0)

    # Hidden Linear + ReLU (+ Dropout p=0 -> identity), unrolled at trace time.
    for l in range(num_hidden):
        h = jnp.dot(h.astype(w_hid_ref.dtype), w_hid_ref[l],
                    preferred_element_type=jnp.float32)
        h = jnp.maximum(h + b_hid_ref[l:l + 1, :], 0.0)

    # Output Linear (full-lane f32 store; padded lanes carry zero weights/bias).
    o_ref[...] = (jnp.dot(h.astype(w_out_ref.dtype), w_out_ref[...],
                          preferred_element_type=jnp.float32)
                  + b_out_ref[...]).astype(o_ref.dtype)


# ----------------------------------------------------------------------------
# One-time parameter packing: fold BN, pad to lane width, cast weights to bf16.
# Call this ONCE per set of weights (hoisted out of the per-call forward path).
# ----------------------------------------------------------------------------
def prepare_params(params, *, noise_std=0.0, dropout_prob=0.0, lane=LANE):
    # Folding both BatchNorm affines across GaussianNoise is only valid when
    # noise/dropout are identities (inference); guard it explicitly.
    assert noise_std == 0.0 and dropout_prob == 0.0, (
        "BN folding assumes inference mode (noise std == 0, dropout p == 0)")

    bn_scale, bn_shift, w_in, b_in, w_hid, b_hid, w_out, b_out = params
    d_in, h = w_in.shape
    d_out = w_out.shape[1]
    num_hidden = int(w_hid.shape[0])

    # Fold both eval-mode BatchNorm affines into the first Linear (in f32).
    s = bn_scale[0] * bn_scale[1]
    t = bn_shift[0] * bn_scale[1] + bn_shift[1]
    w_in_f = s[:, None] * w_in                 # [D_in, H]
    b_in_f = t @ w_in + b_in                   # [H]

    d_in_p = _round_up(d_in, lane)
    h_p = _round_up(h, lane)
    d_out_p = _round_up(d_out, lane)

    def pad2(a, r, c):
        return jnp.pad(a, ((0, r - a.shape[0]), (0, c - a.shape[1])))

    packed = [
        pad2(w_in_f, d_in_p, h_p).astype(jnp.bfloat16),
        pad2(b_in_f[None, :], 1, h_p).astype(jnp.float32),   # 2-D [1, H_p] bias
    ]
    if num_hidden > 0:
        packed.append(jnp.pad(w_hid, ((0, 0), (0, h_p - h), (0, h_p - h)))
                      .astype(jnp.bfloat16))
        packed.append(jnp.pad(b_hid, ((0, 0), (0, h_p - h))).astype(jnp.float32))
    packed.append(pad2(w_out, h_p, d_out_p).astype(jnp.bfloat16))
    packed.append(pad2(b_out[None, :], 1, d_out_p).astype(jnp.float32))

    meta = Meta(d_in=d_in, d_in_p=d_in_p, h_p=h_p, d_out=d_out,
                d_out_p=d_out_p, num_hidden=num_hidden)
    return tuple(packed), meta


# ----------------------------------------------------------------------------
# Forward wrapper (jitted; meta / tiling flags are static).
# ----------------------------------------------------------------------------
def _vmem_limit_bytes():
    cap = 128 << 20
    try:
        cap = int(getattr(pltpu.get_tpu_info(), "vmem_capacity_bytes", cap))
    except Exception:
        pass
    # ~80% of physical VMEM, capped at 100 MiB: ≈51 MiB on v7x (64 MiB/TC),
    # 100 MiB on v5e/v6e (128 MiB) — leaves headroom for compiler scratch.
    return min(int(cap * 0.8), 100 << 20)


def _pick_batch_tiling(batch, batch_tile):
    # Distribute rows evenly over tiles: per-tile padding is < 8 rows instead of
    # the up-to-(tb-8) dead rows of a naive round_up(batch, tb).
    n_tiles = max(1, -(-batch // batch_tile))
    if n_tiles == 1 and batch >= 256:
        # v7x has 2 TensorCores; a 1-step grid leaves one idle. The extra grid
        # step costs ~0.35us on single-TC chips (negligible).
        n_tiles = 2
    tb = _round_up(-(-batch // n_tiles), 8)
    return tb, n_tiles * tb


@partial(jax.jit, static_argnames=("meta", "batch_tile", "single_buffer_weights"))
def simple_nn_forward(x, packed, *, meta, batch_tile=1024,
                      single_buffer_weights=True):
    d_in, d_in_p = meta.d_in, meta.d_in_p
    h_p, d_out, d_out_p = meta.h_p, meta.d_out, meta.d_out_p
    num_hidden = meta.num_hidden

    batch = x.shape[0]
    tb, batch_p = _pick_batch_tiling(batch, batch_tile)

    if batch_p != batch or d_in_p != d_in:
        # Pad + bf16 cast fuse into one XLA op (read f32 once, write bf16 once).
        x_in = jnp.pad(x, ((0, batch_p - batch), (0, d_in_p - d_in))
                       ).astype(jnp.bfloat16)
    else:
        # Already aligned: skip the extra HBM pass; cast to bf16 in-kernel.
        x_in = x

    # Constant-index (resident) operands: single-buffer them -> half the VMEM.
    w_mode = dict(pipeline_mode=pl.Buffered(1)) if single_buffer_weights else {}
    const2 = lambda i: (0, 0)
    const3 = lambda i: (0, 0, 0)

    in_specs = [pl.BlockSpec((tb, d_in_p), lambda i: (i, 0)),       # x: batch-tiled
                pl.BlockSpec((d_in_p, h_p), const2, **w_mode),
                pl.BlockSpec((1, h_p), const2, **w_mode)]
    if num_hidden > 0:
        lh = packed[2].shape[0]
        in_specs += [pl.BlockSpec((lh, h_p, h_p), const3, **w_mode),
                     pl.BlockSpec((lh, h_p), const2, **w_mode)]
    in_specs += [pl.BlockSpec((h_p, d_out_p), const2, **w_mode),
                 pl.BlockSpec((1, d_out_p), const2, **w_mode)]

    weight_bytes = sum(int(a.size) * a.dtype.itemsize for a in packed)
    flops = 2 * batch_p * (d_in_p * h_p + num_hidden * h_p * h_p + h_p * d_out_p)
    bytes_accessed = (int(x_in.size) * x_in.dtype.itemsize + weight_bytes
                      + batch_p * d_out_p * 4)

    out = pl.pallas_call(
        partial(simple_nn_kernel, num_hidden=num_hidden),
        out_shape=jax.ShapeDtypeStruct((batch_p, d_out_p), jnp.float32),
        grid=(batch_p // tb,),
        in_specs=in_specs,
        out_specs=pl.BlockSpec((tb, d_out_p), lambda i: (i, 0)),
        compiler_params=pltpu.CompilerParams(
            dimension_semantics=("parallel",),   # shard batch tiles across TCs (v7x)
            vmem_limit_bytes=_vmem_limit_bytes(),
        ),
        cost_estimate=pl.CostEstimate(flops=flops, transcendentals=0,
                                      bytes_accessed=bytes_accessed),
    )(x_in, *packed)

    return out[:batch, :d_out]


# ----------------------------------------------------------------------------
# Deterministic synthetic parameters mirroring the PyTorch module shapes.
# ----------------------------------------------------------------------------
def init_params(key, input_size, hidden_dim, output_size, num_layers):
    eps = 1e-5
    keys = jax.random.split(key, 8 + 2 * max(num_layers - 1, 0))

    # Two BatchNorm1d(input_size) layers: gamma, beta, running_mean, running_var.
    gamma = jnp.stack([jnp.ones((input_size,), jnp.float32),
                       1.0 + 0.1 * jax.random.normal(keys[0], (input_size,), jnp.float32)])
    beta = jnp.stack([jnp.zeros((input_size,), jnp.float32),
                      0.1 * jax.random.normal(keys[1], (input_size,), jnp.float32)])
    run_mean = jnp.stack([0.05 * jax.random.normal(keys[2], (input_size,), jnp.float32),
                          jnp.zeros((input_size,), jnp.float32)])
    run_var = jnp.stack([jnp.ones((input_size,), jnp.float32),
                         1.0 + 0.05 * jax.random.uniform(keys[3], (input_size,), jnp.float32)])
    bn_scale = gamma / jnp.sqrt(run_var + eps)             # [2, D_in]
    bn_shift = beta - run_mean * bn_scale                  # [2, D_in]

    def linear_init(k, fan_in, fan_out):
        kw, kb = jax.random.split(k)
        bound = 1.0 / jnp.sqrt(float(fan_in))
        w = jax.random.uniform(kw, (fan_in, fan_out), jnp.float32, -bound, bound)
        b = jax.random.uniform(kb, (fan_out,), jnp.float32, -bound, bound)
        return w, b

    w_in, b_in = linear_init(keys[4], input_size, hidden_dim)

    if num_layers - 1 > 0:
        w_hid_list, b_hid_list = [], []
        for i in range(num_layers - 1):
            w, b = linear_init(keys[5 + i], hidden_dim, hidden_dim)
            w_hid_list.append(w)
            b_hid_list.append(b)
        w_hid = jnp.stack(w_hid_list)                      # [L-1, H, H]
        b_hid = jnp.stack(b_hid_list)                      # [L-1, H]
    else:
        w_hid = jnp.zeros((0, hidden_dim, hidden_dim), jnp.float32)
        b_hid = jnp.zeros((0, hidden_dim), jnp.float32)

    w_out, b_out = linear_init(keys[5 + max(num_layers - 1, 0)], hidden_dim, output_size)

    return (bn_scale, bn_shift, w_in, b_in, w_hid, b_hid, w_out, b_out)


def reference_forward(x, params):
    """Pure-JAX f32 reference (eval-mode BN, noise/dropout identities)."""
    bn_scale, bn_shift, w_in, b_in, w_hid, b_hid, w_out, b_out = params
    h = x * bn_scale[0] + bn_shift[0]
    h = h * bn_scale[1] + bn_shift[1]
    h = jnp.maximum(h @ w_in + b_in, 0.0)
    for l in range(w_hid.shape[0]):
        h = jnp.maximum(h @ w_hid[l] + b_hid[l], 0.0)
    return h @ w_out + b_out


if __name__ == "__main__":
    # Small shapes consistent with the module: x is [batch, input_size].
    batch, input_size, hidden_dim, output_size, num_layers = 8, 32, 32, 16, 3

    key = jax.random.PRNGKey(0)
    kx, kp = jax.random.split(key)
    x = jax.random.normal(kx, (batch, input_size), jnp.float32)
    params = init_params(kp, input_size, hidden_dim, output_size, num_layers)

    # BN folding / padding / bf16 cast happens ONCE here, not per forward call.
    packed, meta = prepare_params(params)
    packed = jax.block_until_ready(packed)

    try:
        out = jax.block_until_ready(simple_nn_forward(x, packed, meta=meta))
    except Exception:
        # Fallback if this JAX build rejects single-buffered (Buffered(1)) specs.
        out = jax.block_until_ready(
            simple_nn_forward(x, packed, meta=meta, single_buffer_weights=False))

    ref = reference_forward(x, params)
    assert out.shape == (batch, output_size)
    # bf16 weights/activations with f32 accumulation -> loose tolerance vs f32 ref.
    assert jnp.allclose(out, ref, atol=5e-2, rtol=5e-2), "mismatch vs reference"

    print("KERNEL_OK")
</pallas_src>

<mosaic_0001>
module attributes {stable_mosaic.version = 11 : i64} {
  func.func @simple_nn_kernel(%arg0: i32, %arg1: memref<8x128xbf16, #tpu.memory_space<vmem>>, %arg2: memref<128x128xbf16, #tpu.memory_space<vmem>>, %arg3: memref<1x128xf32, #tpu.memory_space<vmem>>, %arg4: memref<2x128x128xbf16, #tpu.memory_space<vmem>>, %arg5: memref<2x128xf32, #tpu.memory_space<vmem>>, %arg6: memref<128x128xbf16, #tpu.memory_space<vmem>>, %arg7: memref<1x128xf32, #tpu.memory_space<vmem>>, %arg8: memref<8x128xf32, #tpu.memory_space<vmem>>) attributes {dimension_semantics = [#tpu.dimension_semantics<parallel>], iteration_bounds = array<i64: 1>, scalar_prefetch = 0 : i64, scratch_operands = 0 : i64, tpu.core_type = #tpu.core_type<tc>, window_params = [{transform_indices = @transform_0, window_bounds = array<i64: 8, 128>}, {pipeline_mode = #tpu.pipeline_mode<synchronous>, transform_indices = @transform_1, window_bounds = array<i64: 128, 128>}, {pipeline_mode = #tpu.pipeline_mode<synchronous>, transform_indices = @transform_2, window_bounds = array<i64: 1, 128>}, {pipeline_mode = #tpu.pipeline_mode<synchronous>, transform_indices = @transform_3, window_bounds = array<i64: 2, 128, 128>}, {pipeline_mode = #tpu.pipeline_mode<synchronous>, transform_indices = @transform_4, window_bounds = array<i64: 2, 128>}, {pipeline_mode = #tpu.pipeline_mode<synchronous>, transform_indices = @transform_5, window_bounds = array<i64: 128, 128>}, {pipeline_mode = #tpu.pipeline_mode<synchronous>, transform_indices = @transform_6, window_bounds = array<i64: 1, 128>}, {transform_indices = @transform_7, window_bounds = array<i64: 8, 128>}]} {
    %c0 = arith.constant 0 : index
    %c0_0 = arith.constant 0 : index
    %0 = vector.load %arg1[%c0, %c0_0] : memref<8x128xbf16, #tpu.memory_space<vmem>>, vector<8x128xbf16>
    %c0_1 = arith.constant 0 : index
    %c0_2 = arith.constant 0 : index
    %1 = vector.load %arg2[%c0_1, %c0_2] : memref<128x128xbf16, #tpu.memory_space<vmem>>, vector<128x128xbf16>
    %cst = arith.constant dense<0.000000e+00> : vector<8x128xf32>
    %2 = tpu.matmul %0, %1, %cst {dimension_numbers = #tpu.dot_dimension_numbers<[1], [0], [0], [1], [0, 0, 1, 1], [], []>} : vector<8x128xbf16>, vector<128x128xbf16>, vector<8x128xf32> -> vector<8x128xf32>
    %c0_3 = arith.constant 0 : index
    %c0_4 = arith.constant 0 : index
    %3 = vector.load %arg3[%c0_3, %c0_4] : memref<1x128xf32, #tpu.memory_space<vmem>>, vector<1x128xf32>
    %4 = vector.broadcast %3 : vector<1x128xf32> to vector<8x128xf32>
    %5 = arith.addf %2, %4 : vector<8x128xf32>
    %cst_5 = arith.constant 0.000000e+00 : f32
    %6 = vector.broadcast %cst_5 : f32 to vector<8x128xf32>
    %7 = arith.maximumf %5, %6 : vector<8x128xf32>
    %8 = arith.truncf %7 : vector<8x128xf32> to vector<8x128xbf16>
    %c0_6 = arith.constant 0 : index
    %c0_7 = arith.constant 0 : index
    %c0_8 = arith.constant 0 : index
    %9 = vector.load %arg4[%c0_6, %c0_7, %c0_8] : memref<2x128x128xbf16, #tpu.memory_space<vmem>>, vector<1x128x128xbf16>
    %10 = vector.shape_cast %9 : vector<1x128x128xbf16> to vector<128x128xbf16>
    %cst_9 = arith.constant dense<0.000000e+00> : vector<8x128xf32>
    %11 = tpu.matmul %8, %10, %cst_9 {dimension_numbers = #tpu.dot_dimension_numbers<[1], [0], [0], [1], [0, 0, 1, 1], [], []>} : vector<8x128xbf16>, vector<128x128xbf16>, vector<8x128xf32> -> vector<8x128xf32>
    %c0_10 = arith.constant 0 : index
    %c0_11 = arith.constant 0 : index
    %12 = vector.load %arg5[%c0_10, %c0_11] : memref<2x128xf32, #tpu.memory_space<vmem>>, vector<1x128xf32>
    %13 = vector.broadcast %12 : vector<1x128xf32> to vector<8x128xf32>
    %14 = arith.addf %11, %13 : vector<8x128xf32>
    %cst_12 = arith.constant 0.000000e+00 : f32
    %15 = vector.broadcast %cst_12 : f32 to vector<8x128xf32>
    %16 = arith.maximumf %14, %15 : vector<8x128xf32>
    %17 = arith.truncf %16 : vector<8x128xf32> to vector<8x128xbf16>
    %c1 = arith.constant 1 : index
    %c0_13 = arith.constant 0 : index
    %c0_14 = arith.constant 0 : index
    %18 = vector.load %arg4[%c1, %c0_13, %c0_14] : memref<2x128x128xbf16, #tpu.memory_space<vmem>>, vector<1x128x128xbf16>
    %19 = vector.shape_cast %18 : vector<1x128x128xbf16> to vector<128x128xbf16>
    %cst_15 = arith.constant dense<0.000000e+00> : vector<8x128xf32>
    %20 = tpu.matmul %17, %19, %cst_15 {dimension_numbers = #tpu.dot_dimension_numbers<[1], [0], [0], [1], [0, 0, 1, 1], [], []>} : vector<8x128xbf16>, vector<128x128xbf16>, vector<8x128xf32> -> vector<8x128xf32>
    %c1_16 = arith.constant 1 : index
    %c0_17 = arith.constant 0 : index
    %21 = vector.load %arg5[%c1_16, %c0_17] : memref<2x128xf32, #tpu.memory_space<vmem>>, vector<1x128xf32>
    %22 = vector.broadcast %21 : vector<1x128xf32> to vector<8x128xf32>
    %23 = arith.addf %20, %22 : vector<8x128xf32>
    %cst_18 = arith.constant 0.000000e+00 : f32
    %24 = vector.broadcast %cst_18 : f32 to vector<8x128xf32>
    %25 = arith.maximumf %23, %24 : vector<8x128xf32>
    %26 = arith.truncf %25 : vector<8x128xf32> to vector<8x128xbf16>
    %c0_19 = arith.constant 0 : index
    %c0_20 = arith.constant 0 : index
    %27 = vector.load %arg6[%c0_19, %c0_20] : memref<128x128xbf16, #tpu.memory_space<vmem>>, vector<128x128xbf16>
    %cst_21 = arith.constant dense<0.000000e+00> : vector<8x128xf32>
    %28 = tpu.matmul %26, %27, %cst_21 {dimension_numbers = #tpu.dot_dimension_numbers<[1], [0], [0], [1], [0, 0, 1, 1], [], []>} : vector<8x128xbf16>, vector<128x128xbf16>, vector<8x128xf32> -> vector<8x128xf32>
    %c0_22 = arith.constant 0 : index
    %c0_23 = arith.constant 0 : index
    %29 = vector.load %arg7[%c0_22, %c0_23] : memref<1x128xf32, #tpu.memory_space<vmem>>, vector<1x128xf32>
    %30 = vector.broadcast %29 : vector<1x128xf32> to vector<8x128xf32>
    %31 = arith.addf %28, %30 : vector<8x128xf32>
    %c0_24 = arith.constant 0 : index
    %c0_25 = arith.constant 0 : index
    %32 = vector.load %arg8[%c0_24, %c0_25] : memref<8x128xf32, #tpu.memory_space<vmem>>, vector<8x128xf32>
    tpu.vector_store %arg8[%c0_24, %c0_25], %31 {strides = array<i32>} : memref<8x128xf32, #tpu.memory_space<vmem>>, vector<8x128xf32>,
    return
  }
  func.func @transform_0(%arg0: i32) -> (i32, i32) {
    %c0_i32 = arith.constant 0 : i32
    %c0_i32_0 = arith.constant 0 : i32
    return %arg0, %c0_i32 : i32, i32
  }
  func.func @transform_1(%arg0: i32) -> (i32, i32) {
    %c0_i32 = arith.constant 0 : i32
    %c0_i32_0 = arith.constant 0 : i32
    %c0_i32_1 = arith.constant 0 : i32
    return %c0_i32, %c0_i32_0 : i32, i32
  }
  func.func @transform_2(%arg0: i32) -> (i32, i32) {
    %c0_i32 = arith.constant 0 : i32
    %c0_i32_0 = arith.constant 0 : i32
    %c0_i32_1 = arith.constant 0 : i32
    return %c0_i32, %c0_i32_0 : i32, i32
  }
  func.func @transform_3(%arg0: i32) -> (i32, i32, i32) {
    %c0_i32 = arith.constant 0 : i32
    %c0_i32_0 = arith.constant 0 : i32
    %c0_i32_1 = arith.constant 0 : i32
    %c0_i32_2 = arith.constant 0 : i32
    return %c0_i32, %c0_i32_0, %c0_i32_1 : i32, i32, i32
  }
  func.func @transform_4(%arg0: i32) -> (i32, i32) {
    %c0_i32 = arith.constant 0 : i32
    %c0_i32_0 = arith.constant 0 : i32
    %c0_i32_1 = arith.constant 0 : i32
    return %c0_i32, %c0_i32_0 : i32, i32
  }
  func.func @transform_5(%arg0: i32) -> (i32, i32) {
    %c0_i32 = arith.constant 0 : i32
    %c0_i32_0 = arith.constant 0 : i32
    %c0_i32_1 = arith.constant 0 : i32
    return %c0_i32, %c0_i32_0 : i32, i32
  }
  func.func @transform_6(%arg0: i32) -> (i32, i32) {
    %c0_i32 = arith.constant 0 : i32
    %c0_i32_0 = arith.constant 0 : i32
    %c0_i32_1 = arith.constant 0 : i32
    return %c0_i32, %c0_i32_0 : i32, i32
  }
  func.func @transform_7(%arg0: i32) -> (i32, i32) {
    %c0_i32 = arith.constant 0 : i32
    %c0_i32_0 = arith.constant 0 : i32
    return %arg0, %c0_i32 : i32, i32
  }
}

module attributes {stable_mosaic.version = 11 : i64} {
  func.func @simple_nn_kernel(%arg0: i32, %arg1: memref<8x128xbf16, #tpu.memory_space<vmem>>, %arg2: memref<128x128xbf16, #tpu.memory_space<vmem>>, %arg3: memref<1x128xf32, #tpu.memory_space<vmem>>, %arg4: memref<2x128x128xbf16, #tpu.memory_space<vmem>>, %arg5: memref<2x128xf32, #tpu.memory_space<vmem>>, %arg6: memref<128x128xbf16, #tpu.memory_space<vmem>>, %arg7: memref<1x128xf32, #tpu.memory_space<vmem>>, %arg8: memref<8x128xf32, #tpu.memory_space<vmem>>) attributes {dimension_semantics = [#tpu.dimension_semantics<parallel>], iteration_bounds = array<i64: 1>, scalar_prefetch = 0 : i64, scratch_operands = 0 : i64, tpu.core_type = #tpu.core_type<tc>, window_params = [{transform_indices = @transform_0, window_bounds = array<i64: 8, 128>}, {pipeline_mode = #tpu.pipeline_mode<synchronous>, transform_indices = @transform_1, window_bounds = array<i64: 128, 128>}, {pipeline_mode = #tpu.pipeline_mode<synchronous>, transform_indices = @transform_2, window_bounds = array<i64: 1, 128>}, {pipeline_mode = #tpu.pipeline_mode<synchronous>, transform_indices = @transform_3, window_bounds = array<i64: 2, 128, 128>}, {pipeline_mode = #tpu.pipeline_mode<synchronous>, transform_indices = @transform_4, window_bounds = array<i64: 2, 128>}, {pipeline_mode = #tpu.pipeline_mode<synchronous>, transform_indices = @transform_5, window_bounds = array<i64: 128, 128>}, {pipeline_mode = #tpu.pipeline_mode<synchronous>, transform_indices = @transform_6, window_bounds = array<i64: 1, 128>}, {transform_indices = @transform_7, window_bounds = array<i64: 8, 128>}]} {
    %c0 = arith.constant 0 : index
    %c0_0 = arith.constant 0 : index
    %0 = vector.load %arg1[%c0, %c0_0] : memref<8x128xbf16, #tpu.memory_space<vmem>>, vector<8x128xbf16>
    %c0_1 = arith.constant 0 : index
    %c0_2 = arith.constant 0 : index
    %1 = vector.load %arg2[%c0_1, %c0_2] : memref<128x128xbf16, #tpu.memory_space<vmem>>, vector<128x128xbf16>
    %cst = arith.constant dense<0.000000e+00> : vector<8x128xf32>
    %2 = tpu.matmul %0, %1, %cst {dimension_numbers = #tpu.dot_dimension_numbers<[1], [0], [0], [1], [0, 0, 1, 1], [], []>} : vector<8x128xbf16>, vector<128x128xbf16>, vector<8x128xf32> -> vector<8x128xf32>
    %c0_3 = arith.constant 0 : index
    %c0_4 = arith.constant 0 : index
    %3 = vector.load %arg3[%c0_3, %c0_4] : memref<1x128xf32, #tpu.memory_space<vmem>>, vector<1x128xf32>
    %4 = vector.broadcast %3 : vector<1x128xf32> to vector<8x128xf32>
    %5 = arith.addf %2, %4 : vector<8x128xf32>
    %cst_5 = arith.constant 0.000000e+00 : f32
    %6 = vector.broadcast %cst_5 : f32 to vector<8x128xf32>
    %7 = arith.maximumf %5, %6 : vector<8x128xf32>
    %8 = arith.truncf %7 : vector<8x128xf32> to vector<8x128xbf16>
    %c0_6 = arith.constant 0 : index
    %c0_7 = arith.constant 0 : index
    %c0_8 = arith.constant 0 : index
    %9 = vector.load %arg4[%c0_6, %c0_7, %c0_8] : memref<2x128x128xbf16, #tpu.memory_space<vmem>>, vector<1x128x128xbf16>
    %10 = vector.shape_cast %9 : vector<1x128x128xbf16> to vector<128x128xbf16>
    %cst_9 = arith.constant dense<0.000000e+00> : vector<8x128xf32>
    %11 = tpu.matmul %8, %10, %cst_9 {dimension_numbers = #tpu.dot_dimension_numbers<[1], [0], [0], [1], [0, 0, 1, 1], [], []>} : vector<8x128xbf16>, vector<128x128xbf16>, vector<8x128xf32> -> vector<8x128xf32>
    %c0_10 = arith.constant 0 : index
    %c0_11 = arith.constant 0 : index
    %12 = vector.load %arg5[%c0_10, %c0_11] : memref<2x128xf32, #tpu.memory_space<vmem>>, vector<1x128xf32>
    %13 = vector.broadcast %12 : vector<1x128xf32> to vector<8x128xf32>
    %14 = arith.addf %11, %13 : vector<8x128xf32>
    %cst_12 = arith.constant 0.000000e+00 : f32
    %15 = vector.broadcast %cst_12 : f32 to vector<8x128xf32>
    %16 = arith.maximumf %14, %15 : vector<8x128xf32>
    %17 = arith.truncf %16 : vector<8x128xf32> to vector<8x128xbf16>
    %c1 = arith.constant 1 : index
    %c0_13 = arith.constant 0 : index
    %c0_14 = arith.constant 0 : index
    %18 = vector.load %arg4[%c1, %c0_13, %c0_14] : memref<2x128x128xbf16, #tpu.memory_space<vmem>>, vector<1x128x128xbf16>
    %19 = vector.shape_cast %18 : vector<1x128x128xbf16> to vector<128x128xbf16>
    %cst_15 = arith.constant dense<0.000000e+00> : vector<8x128xf32>
    %20 = tpu.matmul %17, %19, %cst_15 {dimension_numbers = #tpu.dot_dimension_numbers<[1], [0], [0], [1], [0, 0, 1, 1], [], []>} : vector<8x128xbf16>, vector<128x128xbf16>, vector<8x128xf32> -> vector<8x128xf32>
    %c1_16 = arith.constant 1 : index
    %c0_17 = arith.constant 0 : index
    %21 = vector.load %arg5[%c1_16, %c0_17] : memref<2x128xf32, #tpu.memory_space<vmem>>, vector<1x128xf32>
    %22 = vector.broadcast %21 : vector<1x128xf32> to vector<8x128xf32>
    %23 = arith.addf %20, %22 : vector<8x128xf32>
    %cst_18 = arith.constant 0.000000e+00 : f32
    %24 = vector.broadcast %cst_18 : f32 to vector<8x128xf32>
    %25 = arith.maximumf %23, %24 : vector<8x128xf32>
    %26 = arith.truncf %25 : vector<8x128xf32> to vector<8x128xbf16>
    %c0_19 = arith.constant 0 : index
    %c0_20 = arith.constant 0 : index
    %27 = vector.load %arg6[%c0_19, %c0_20] : memref<128x128xbf16, #tpu.memory_space<vmem>>, vector<128x128xbf16>
    %cst_21 = arith.constant dense<0.000000e+00> : vector<8x128xf32>
    %28 = tpu.matmul %26, %27, %cst_21 {dimension_numbers = #tpu.dot_dimension_numbers<[1], [0], [0], [1], [0, 0, 1, 1], [], []>} : vector<8x128xbf16>, vector<128x128xbf16>, vector<8x128xf32> -> vector<8x128xf32>
    %c0_22 = arith.constant 0 : index
    %c0_23 = arith.constant 0 : index
    %29 = vector.load %arg7[%c0_22, %c0_23] : memref<1x128xf32, #tpu.memory_space<vmem>>, vector<1x128xf32>
    %30 = vector.broadcast %29 : vector<1x128xf32> to vector<8x128xf32>
    %31 = arith.addf %28, %30 : vector<8x128xf32>
    %c0_24 = arith.constant 0 : index
    %c0_25 = arith.constant 0 : index
    %32 = vector.load %arg8[%c0_24, %c0_25] : memref<8x128xf32, #tpu.memory_space<vmem>>, vector<8x128xf32>
    tpu.vector_store %arg8[%c0_24, %c0_25], %31 {strides = array<i32>} : memref<8x128xf32, #tpu.memory_space<vmem>>, vector<8x128xf32>,
    return
  }
  func.func @transform_0(%arg0: i32) -> (i32, i32) {
    %c0_i32 = arith.constant 0 : i32
    %c0_i32_0 = arith.constant 0 : i32
    return %arg0, %c0_i32 : i32, i32
  }
  func.func @transform_1(%arg0: i32) -> (i32, i32) {
    %c0_i32 = arith.constant 0 : i32
    %c0_i32_0 = arith.constant 0 : i32
    %c0_i32_1 = arith.constant 0 : i32
    return %c0_i32, %c0_i32_0 : i32, i32
  }
  func.func @transform_2(%arg0: i32) -> (i32, i32) {
    %c0_i32 = arith.constant 0 : i32
    %c0_i32_0 = arith.constant 0 : i32
    %c0_i32_1 = arith.constant 0 : i32
    return %c0_i32, %c0_i32_0 : i32, i32
  }
  func.func @transform_3(%arg0: i32) -> (i32, i32, i32) {
    %c0_i32 = arith.constant 0 : i32
    %c0_i32_0 = arith.constant 0 : i32
    %c0_i32_1 = arith.constant 0 : i32
    %c0_i32_2 = arith.constant 0 : i32
    return %c0_i32, %c0_i32_0, %c0_i32_1 : i32, i32, i32
  }
  func.func @transform_4(%arg0: i32) -> (i32, i32) {
    %c0_i32 = arith.constant 0 : i32
    %c0_i32_0 = arith.constant 0 : i32
    %c0_i32_1 = arith.constant 0 : i32
    return %c0_i32, %c0_i32_0 : i32, i32
  }
  func.func @transform_5(%arg0: i32) -> (i32, i32) {
    %c0_i32 = arith.constant 0 : i32
    %c0_i32_0 = arith.constant 0 : i32
    %c0_i32_1 = arith.constant 0 : i32
    return %c0_i32, %c0_i32_0 : i32, i32
  }
  func.func @transform_6(%arg0: i32) -> (i32, i32) {
    %c0_i32 = arith.constant 0 : i32
    %c0_i32_0 = arith.constant 0 : i32
    %c0_i32_1 = arith.constant 0 : i32
    return %c0_i32, %c0_i32_0 : i32, i32
  }
  func.func @transform_7(%arg0: i32) -> (i32, i32) {
    %c0_i32 = arith.constant 0 : i32
    %c0_i32_0 = arith.constant 0 : i32
    return %arg0, %c0_i32 : i32, i32
  }
}

</mosaic_0001>

<bundles_post_ra>
// kernel: simple_nn_forward.1
= control target key start
LH: loop header
LB: loop body
LE: loop exit
PB: predicated region body
PF: predicated region fallthrough
CT: control target
= control target key end

     0   :  { %12 = vsyncpa [#allocation3], 0  ;;  %s1161_s0 = inlined_call_operand.hbm [shape: bf16[8,128], index: 0, kind: input, shape index: {}]   ;;  %s1162_s1 = inlined_call_operand.hbm [shape: bf16[128,128], index: 1, kind: input, shape index: {}]   ;;  %s1163_s2 = inlined_call_operand.hbm [shape: f32[1,128], index: 2, kind: input, shape index: {}]   ;;  %s1164_s3 = inlined_call_operand.hbm [shape: bf16[2,128,128], index: 3, kind: input, shape index: {}]   ;;  %s1165_s4 = inlined_call_operand.hbm [shape: f32[2,128], index: 4, kind: input, shape index: {}]   ;;  %s1166_s5 = inlined_call_operand.hbm [shape: bf16[128,128], index: 5, kind: input, shape index: {}]   ;;  %s1167_s6 = inlined_call_operand.hbm [shape: f32[1,128], index: 6, kind: input, shape index: {}]   ;;  %s1168_s7 = inlined_call_operand.hbm [shape: f32[8,128], index: 7, kind: output, shape index: {}]  }
   0x1   :  { %13 = vsyncpa [#allocation6], 0 }
   0x2   :  { %14 = vsyncpa [#allocation9], 0 }
   0x3   :  { %15 = vsyncpa [#allocation12], 0 }
   0x4   :  { %16 = vsyncpa [#allocation4], 0  ;;  %s964_s24 = smov [#allocation5]   ;;  %s778_s28 = scalar_lea.hbm %s1162_s1, 1024 }
   0x5   :  { %s32_s25 = sshll.u32 %s964_s24, 4  ;;  %p779_p0 = scmp.ne.s32.totalorder %s1162_s1, %s778_s28  ;;  %s33_s25 = int_to_ptr.vmem [resolvable:$true] %s32_s25 }
   0x6   :  { %p782_p1 = scmp.lt.u32.totalorder %s778_s28, %s1162_s1 }
   0x8   :  { %p784_p2 = pnand %p782_p1, %p779_p0 }
   0xa   :  { %787 = shalt.err (!%p784_p2)
}
   0xb   :  { %s788_s10 = scalar_lea.vmem %s33_s25, 1024  ;;  %p793_p4 = scmp.lt.s32.totalorder %s33_s25, %s33_s25 }
   0xc   :  { %p789_p3 = scmp.ne.s32.totalorder %s33_s25, %s788_s10  ;;  %p794_p5 = scmp.lt.s32.totalorder %s788_s10, %s788_s10 }
   0xe   :  { %p795_p6 = por %p794_p5, %p793_p4 }
  0x10   :  { %p796_p7 = pnand %p795_p6, %p789_p3 }
  0x12   :  { %799 = shalt.err (!%p796_p7)
}
  0x13   :  { %s965_s11 = smov 64   ;;  %s966_s12 = smov 4  }
  0x14   :  { %38 = dma.hbm_to_vmem [thread:$0]  %s1162_s1, 1024, %s33_s25, [#allocation6], %s965_s11, %s965_s11, %s966_s12  }
  0x15   :  { %s967_s15 = smov [#allocation8]   ;;  %s968_s17 = smov [#allocation11]  }
  0x16   :  { %s54_s16 = sshll.u32 %s967_s15, 4  ;;  %s76_s18 = sshll.u32 %s968_s17, 4  ;;  %s55_s16 = int_to_ptr.vmem [resolvable:$true] %s54_s16  ;;  %s77_s18 = int_to_ptr.vmem [resolvable:$true] %s76_s18 }
  0x17   :  { %s800_s21 = scalar_lea.hbm %s1164_s3, 2048 }
  0x18   :  { %p801_p8 = scmp.ne.s32.totalorder %s1164_s3, %s800_s21  ;;  %p804_p9 = scmp.lt.u32.totalorder %s800_s21, %s1164_s3 }
  0x1a   :  { %p806_p10 = pnand %p804_p9, %p801_p8 }
  0x1c   :  { %809 = shalt.err (!%p806_p10)
}
  0x1d   :  { %s810_s1 = scalar_lea.vmem %s55_s16, 2048  ;;  %p815_p12 = scmp.lt.s32.totalorder %s55_s16, %s55_s16 }
  0x1e   :  { %p811_p11 = scmp.ne.s32.totalorder %s55_s16, %s810_s1  ;;  %p816_p13 = scmp.lt.s32.totalorder %s810_s1, %s810_s1 }
  0x20   :  { %p817_p0 = por %p816_p13, %p815_p12 }
  0x22   :  { %p818_p1 = pnand %p817_p0, %p811_p11 }
  0x24   :  { %821 = shalt.err (!%p818_p1)
}
  0x25   :  { %60 = dma.hbm_to_vmem [thread:$0]  %s1164_s3, 2048, %s55_s16, [#allocation9], %s965_s11, %s965_s11, %s966_s12  }
  0x26   :  { %s822_s30 = scalar_lea.hbm %s1166_s5, 1024 }
  0x27   :  { %p823_p2 = scmp.ne.s32.totalorder %s1166_s5, %s822_s30  ;;  %p826_p3 = scmp.lt.u32.totalorder %s822_s30, %s1166_s5 }
  0x29   :  { %p828_p4 = pnand %p826_p3, %p823_p2 }
  0x2b   :  { %831 = shalt.err (!%p828_p4)
}
  0x2c   :  { %s832_s14 = scalar_lea.vmem %s77_s18, 1024  ;;  %p837_p6 = scmp.lt.s32.totalorder %s77_s18, %s77_s18 }
  0x2d   :  { %p833_p5 = scmp.ne.s32.totalorder %s77_s18, %s832_s14  ;;  %p838_p7 = scmp.lt.s32.totalorder %s832_s14, %s832_s14 }
  0x2f   :  { %p839_p8 = por %p838_p7, %p837_p6 }
  0x31   :  { %p840_p9 = pnand %p839_p8, %p833_p5 }
  0x33   :  { %843 = shalt.err (!%p840_p9)
}
  0x34   :  { %82 = dma.hbm_to_vmem [thread:$0]  %s1166_s5, 1024, %s77_s18, [#allocation12], %s965_s11, %s965_s11, %s966_s12  }
  0x35   :  { %s969_s16 = smov [#allocation2]   ;;  %s970_s19 = smov [#allocation7]  }
  0x36   :  { %s23_s17 = sshll.u32 %s969_s16, 4  ;;  %s45_s20 = sshll.u32 %s970_s19, 4  ;;  %s24_s17 = int_to_ptr.vmem [resolvable:$true] %s23_s17  ;;  %s46_s20 = int_to_ptr.vmem [resolvable:$true] %s45_s20 }
  0x37   :  { %s844_s23 = scalar_lea.hbm %s1161_s0, 64 }
  0x38   :  { %p845_p10 = scmp.ne.s32.totalorder %s1161_s0, %s844_s23  ;;  %p848_p11 = scmp.lt.u32.totalorder %s844_s23, %s1161_s0 }
  0x3a   :  { %p850_p12 = pnand %p848_p11, %p845_p10 }
  0x3c   :  { %853 = shalt.err (!%p850_p12)
}
  0x3d   :  { %s854_s5 = scalar_lea.vmem %s24_s17, 64  ;;  %p859_p0 = scmp.lt.s32.totalorder %s24_s17, %s24_s17 }
  0x3e   :  { %p855_p13 = scmp.ne.s32.totalorder %s24_s17, %s854_s5  ;;  %p860_p1 = scmp.lt.s32.totalorder %s854_s5, %s854_s5 }
  0x40   :  { %p861_p2 = por %p860_p1, %p859_p0 }
  0x42   :  { %p862_p3 = pnand %p861_p2, %p855_p13 }
  0x44   :  { %865 = shalt.err (!%p862_p3)
}
  0x45   :  { %26 = dma.hbm_to_vmem [thread:$0]  %s1161_s0, 64, %s24_s17, [#allocation3]  }
  0x46   :  { %s866_s28 = scalar_lea.hbm %s1163_s2, 16 }
  0x47   :  { %p867_p4 = scmp.ne.s32.totalorder %s1163_s2, %s866_s28  ;;  %p870_p5 = scmp.lt.u32.totalorder %s866_s28, %s1163_s2 }
  0x49   :  { %p872_p6 = pnand %p870_p5, %p867_p4 }
  0x4b   :  { %875 = shalt.err (!%p872_p6)
}
  0x4c   :  { %s876_s10 = scalar_lea.vmem %s46_s20, 16  ;;  %s880_s13 = scalar_lea.vmem %s46_s20, 32 }
  0x4d   :  { %p877_p7 = scmp.ne.s32.totalorder %s46_s20, %s876_s10  ;;  %p881_p8 = scmp.lt.s32.totalorder %s46_s20, %s46_s20 }
  0x4e   :  { %p882_p9 = scmp.lt.s32.totalorder %s880_s13, %s876_s10 }
  0x50   :  { %p883_p10 = por %p882_p9, %p881_p8 }
  0x52   :  { %p884_p11 = pnand %p883_p10, %p877_p7 }
  0x54   :  { %887 = shalt.err (!%p884_p11)
}
  0x55   :  { %48 = dma.hbm_to_vmem [thread:$0]  %s1163_s2, 16, %s46_s20, [#allocation6]  }
  0x56   :  { %s971_s3 = smov [#allocation10]   ;;  %s972_s16 = smov [#allocation13]  }
  0x57   :  { %s67_s15 = sshll.u32 %s971_s3, 4  ;;  %s89_s17 = sshll.u32 %s972_s16, 4  ;;  %s68_s15 = int_to_ptr.vmem [resolvable:$true] %s67_s15  ;;  %s90_s17 = int_to_ptr.vmem [resolvable:$true] %s89_s17 }
  0x58   :  { %s888_s22 = scalar_lea.hbm %s1165_s4, 32 }
  0x59   :  { %p889_p12 = scmp.ne.s32.totalorder %s1165_s4, %s888_s22  ;;  %p892_p13 = scmp.lt.u32.totalorder %s888_s22, %s1165_s4 }
  0x5b   :  { %p894_p0 = pnand %p892_p13, %p889_p12 }
  0x5d   :  { %897 = shalt.err (!%p894_p0)
}
  0x5e   :  { %s898_s2 = scalar_lea.vmem %s68_s15, 32  ;;  %p903_p2 = scmp.lt.s32.totalorder %s68_s15, %s68_s15 }
  0x5f   :  { %p899_p1 = scmp.ne.s32.totalorder %s68_s15, %s898_s2  ;;  %p904_p3 = scmp.lt.s32.totalorder %s898_s2, %s898_s2 }
  0x61   :  { %p905_p4 = por %p904_p3, %p903_p2 }
  0x63   :  { %p906_p5 = pnand %p905_p4, %p899_p1 }
  0x65   :  { %909 = shalt.err (!%p906_p5)
}
  0x66   :  { %70 = dma.hbm_to_vmem [thread:$0]  %s1165_s4, 32, %s68_s15, [#allocation9]  }
  0x67   :  { %s910_s12 = scalar_lea.hbm %s1167_s6, 16 }
  0x68   :  { %p911_p6 = scmp.ne.s32.totalorder %s1167_s6, %s910_s12  ;;  %p914_p7 = scmp.lt.u32.totalorder %s910_s12, %s1167_s6 }
  0x6a   :  { %p916_p8 = pnand %p914_p7, %p911_p6 }
  0x6c   :  { %919 = shalt.err (!%p916_p8)
}
  0x6d   :  { %s920_s30 = scalar_lea.vmem %s90_s17, 16  ;;  %s924_s8 = scalar_lea.vmem %s90_s17, 32 }
  0x6e   :  { %p921_p9 = scmp.ne.s32.totalorder %s90_s17, %s920_s30  ;;  %p925_p10 = scmp.lt.s32.totalorder %s90_s17, %s90_s17 }
  0x6f   :  { %p926_p11 = scmp.lt.s32.totalorder %s924_s8, %s920_s30 }
  0x71   :  { %p927_p12 = por %p926_p11, %p925_p10 }
  0x73   :  { %p928_p13 = pnand %p927_p12, %p921_p9 }
  0x75   :  { %931 = shalt.err (!%p928_p13)
}
  0x76   :  { %92 = dma.hbm_to_vmem [thread:$0]  %s1167_s6, 16, %s90_s17, [#allocation12]  }
  0x77   :  { %954 = dma.done.wait [#allocation3], 64  }
  0x78   :  { %955 = vsyncadd [#allocation3], 4294967232 }
  0x79   :  { %956 = dma.done.wait [#allocation6], 1040  }
  0x7a   :  { %957 = vsyncadd [#allocation6], 4294966256 }
  0x7b   :  { %958 = dma.done.wait [#allocation9], 2080  }
  0x7c   :  { %959 = vsyncadd [#allocation9], 4294965216 }
  0x7d   :  { %960 = dma.done.wait [#allocation12], 1040  }
  0x7e   :  { %961 = vsyncadd [#allocation12], 4294966256  ;;  %v973_v0 = vmov 0.0   ;;  %vm974_vm0 = vmmov 0   ;;  %v746_v1 = vld [vmem:[#allocation5] sm:$0xff]   ;;  %v747_v2 = vld [vmem:[#allocation5 + $0x8] sm:$0xff]  }
  0x7f   :  { %654 = vmatprep.subr.bf16.mxu0 %v973_v0  ;;  %670 = vmatprep.mubr.msk.bf16.mxu0 %vm974_vm0, %v973_v0  ;;  %v748_v3 = vld [vmem:[#allocation5 + $0x10] sm:$0xff]   ;;  %v754_v4 = vld [vmem:[#allocation8] sm:$0xff]   ;;  %v749_v5 = vld [vmem:[#allocation5 + $0x18] sm:$0xff]   ;;  %s975_s6 = smov [#allocation14]  }
  0x80   :  { %674 = vmatprep.subr.bf16.mxu1 %v973_v0  ;;  %690 = vmatprep.mubr.msk.bf16.mxu1 %vm974_vm0, %v973_v0  ;;  %v755_v6 = vld [vmem:[#allocation8 + $0x8] sm:$0xff]   ;;  %v750_v7 = vld [vmem:[#allocation5 + $0x20] sm:$0xff]   ;;  %v756_v8 = vld [vmem:[#allocation8 + $0x10] sm:$0xff]   ;;  %s570_s10 = sshll.u32 %s975_s6, 4  ;;  %s571_s10 = int_to_ptr.vmem [resolvable:$true] %s570_s10 }
  0x81   :  { %655 = vmatpush3.bf16.msra.mxu0 %v746_v1  ;;  %675 = vmatpush3.bf16.msra.mxu1 %v754_v4  ;;  %v751_v9 = vld [vmem:[#allocation5 + $0x28] sm:$0xff]   ;;  %v757_v10 = vld [vmem:[#allocation8 + $0x18] sm:$0xff]   ;;  %v752_v11 = vld [vmem:[#allocation5 + $0x30] sm:$0xff]   ;;  %s932_s13 = scalar_lea.vmem %s571_s10, 128  ;;  %p937_p1 = scmp.lt.s32.totalorder %s571_s10, %s571_s10 }
  0x82   :  { %656 = vmatprep.subr.bf16.mxu0 %v973_v0  ;;  %676 = vmatprep.subr.bf16.mxu1 %v973_v0  ;;  %v758_v12 = vld [vmem:[#allocation8 + $0x20] sm:$0xff]   ;;  %v753_v13 = vld [vmem:[#allocation5 + $0x38] sm:$0xff]   ;;  %v759_v14 = vld [vmem:[#allocation8 + $0x28] sm:$0xff]   ;;  %p933_p0 = scmp.ne.s32.totalorder %s571_s10, %s932_s13  ;;  %p938_p2 = scmp.lt.s32.totalorder %s932_s13, %s932_s13 }
  0x83   :  { %v115_v15 = vld [vmem:[#allocation2] sm:$0xf]  ;;  %v760_v16 = vld [vmem:[#allocation8 + $0x30] sm:$0xff]   ;;  %v762_v18 = vld [vmem:[#allocation8 + $0x40] sm:$0xff]  }
  0x84   :  { %v761_v17 = vld [vmem:[#allocation8 + $0x38] sm:$0xff]   ;;  %v763_v19 = vld [vmem:[#allocation8 + $0x48] sm:$0xff]   ;;  %v764_v20 = vld [vmem:[#allocation8 + $0x50] sm:$0xff]   ;;  %p939_p3 = por %p938_p2, %p937_p1 }
  0x85   :  { %657 = vmatpush3.bf16.msra.mxu0 %v747_v2  ;;  %677 = vmatpush3.bf16.msra.mxu1 %v755_v6  ;;  %v765_v21 = vld [vmem:[#allocation8 + $0x58] sm:$0xff]   ;;  %v766_v22 = vld [vmem:[#allocation8 + $0x60] sm:$0xff]   ;;  %v767_v23 = vld [vmem:[#allocation8 + $0x68] sm:$0xff]  }
  0x86   :  { %658 = vmatprep.subr.bf16.mxu0 %v973_v0  ;;  %678 = vmatprep.subr.bf16.mxu1 %v973_v0  ;;  %v582_v24 = vld [vmem:[#allocation7] ss:$0 sm:$0xff]  ;;  %v768_v32 = vld [vmem:[#allocation8 + $0x70] sm:$0xff]   ;;  %v770_v34 = vld [vmem:[#allocation11] sm:$0xff]   ;;  %p940_p4 = pnand %p939_p3, %p933_p0 }
  0x87   :  { %v769_v33 = vld [vmem:[#allocation8 + $0x78] sm:$0xff]   ;;  %v771_v35 = vld [vmem:[#allocation11 + $0x8] sm:$0xff]   ;;  %v774_v38 = vld [vmem:[#allocation11 + $0x20] sm:$0xff]  }
  0x88   :  { %v772_v36 = vld [vmem:[#allocation11 + $0x10] sm:$0xff]   ;;  %v773_v37 = vld [vmem:[#allocation11 + $0x18] sm:$0xff]   ;;  %v775_v39 = vld [vmem:[#allocation11 + $0x28] sm:$0xff]  }
  0x89   :  { %659 = vmatpush3.bf16.msra.mxu0 %v748_v3  ;;  %679 = vmatpush3.bf16.msra.mxu1 %v756_v8  ;;  %v591_v40 = vld [vmem:[#allocation10] ss:$0 sm:$0xff]  ;;  %v776_v48 = vld [vmem:[#allocation11 + $0x30] sm:$0xff]   ;;  %v600_v50 = vld [vmem:[#allocation10 + $0x1] ss:$0 sm:$0xff] }
  0x8a   :  { %660 = vmatprep.subr.bf16.mxu0 %v973_v0  ;;  %680 = vmatprep.subr.bf16.mxu1 %v973_v0  ;;  %v777_v49 = vld [vmem:[#allocation11 + $0x38] sm:$0xff]   ;;  %v609_v58 = vld [vmem:[#allocation13] ss:$0 sm:$0xff] }
  0x8d   :  { %661 = vmatpush3.bf16.msra.mxu0 %v749_v5  ;;  %681 = vmatpush3.bf16.msra.mxu1 %v757_v10 }
  0x8e   :  { %662 = vmatprep.subr.bf16.mxu0 %v973_v0  ;;  %682 = vmatprep.subr.bf16.mxu1 %v973_v0 }
  0x91   :  { %663 = vmatpush3.bf16.msra.mxu0 %v750_v7  ;;  %683 = vmatpush3.bf16.msra.mxu1 %v758_v12 }
  0x92   :  { %664 = vmatprep.subr.bf16.mxu0 %v973_v0  ;;  %684 = vmatprep.subr.bf16.mxu1 %v973_v0 }
  0x95   :  { %665 = vmatpush3.bf16.msra.mxu0 %v751_v9  ;;  %685 = vmatpush3.bf16.msra.mxu1 %v759_v14 }
  0x96   :  { %666 = vmatprep.subr.bf16.mxu0 %v973_v0  ;;  %686 = vmatprep.subr.bf16.mxu1 %v973_v0 }
  0x99   :  { %667 = vmatpush3.bf16.msra.mxu0 %v752_v11  ;;  %687 = vmatpush3.bf16.msra.mxu1 %v760_v16 }
  0x9a   :  { %668 = vmatprep.subr.bf16.mxu0 %v973_v0  ;;  %688 = vmatprep.subr.bf16.mxu1 %v973_v0 }
  0x9d   :  { %669 = vmatpush3.bf16.msra.mxu0 %v753_v13  ;;  %689 = vmatpush3.bf16.msra.mxu1 %v761_v17 }
  0x9e   :  { %694 = vmatprep.subr.bf16.mxu0 %v973_v0  ;;  %714 = vmatprep.subr.bf16.mxu1 %v973_v0 }
  0xa0   :  { %671 = vmatmul.mubr.bf16.vlgmr.msra.gmra.mrb[0].mxu0 %v115_v15 }
  0xa1   :  { %710 = vmatprep.mubr.msk.bf16.mxu0 %vm974_vm0, %v973_v0  ;;  %695 = vmatpush3.bf16.msra.mxu0 %v762_v18 }
  0xa2   :  { %696 = vmatprep.subr.bf16.mxu0 %v973_v0 }
  0xa5   :  { %697 = vmatpush3.bf16.msra.mxu0 %v763_v19 }
  0xa6   :  { %698 = vmatprep.subr.bf16.mxu0 %v973_v0 }
  0xa9   :  { %699 = vmatpush3.bf16.msra.mxu0 %v764_v20 }
  0xaa   :  { %700 = vmatprep.subr.bf16.mxu0 %v973_v0 }
  0xad   :  { %701 = vmatpush3.bf16.msra.mxu0 %v765_v21 }
  0xae   :  { %702 = vmatprep.subr.bf16.mxu0 %v973_v0 }
  0xb1   :  { %703 = vmatpush3.bf16.msra.mxu0 %v766_v22 }
  0xb2   :  { %704 = vmatprep.subr.bf16.mxu0 %v973_v0 }
  0xb5   :  { %705 = vmatpush3.bf16.msra.mxu0 %v767_v23 }
  0xb6   :  { %706 = vmatprep.subr.bf16.mxu0 %v973_v0 }
  0xb9   :  { %707 = vmatpush3.bf16.msra.mxu0 %v768_v32 }
  0xba   :  { %708 = vmatprep.subr.bf16.mxu0 %v973_v0 }
  0xbd   :  { %709 = vmatpush3.bf16.msra.mxu0 %v769_v33 }
 0x173   :  { %v221_v25 = vpop.f32.mrb[0].mxu0 }
 0x174   :  { %v222_v26 = vadd.f32 %v582_v24, %v221_v25  ;;  %v672_v27 = vpop.f32.mrb[1].mxu0 }
 0x175   :  { %v224_v28 = vpop.f32.mrb[2].mxu0 }
 0x176   :  { %v227_v29 = vmax.f32 %v222_v26, 0.0  ;;  %v673_v30 = vpop.f32.mrb[3].mxu0 }
 0x178   :  { %v228_v31 = vpack.c.bf16 %v227_v29, %v227_v29 }
 0x17a   :  { %691 = vmatmul.mubr.bf16.vlgmr.msra.gmra.mrb[0].mxu1 %v228_v31 }
 0x17b   :  { %730 = vmatprep.mubr.msk.bf16.mxu1 %vm974_vm0, %v973_v0  ;;  %715 = vmatpush3.bf16.msra.mxu1 %v770_v34 }
 0x17c   :  { %716 = vmatprep.subr.bf16.mxu1 %v973_v0 }
 0x17f   :  { %717 = vmatpush3.bf16.msra.mxu1 %v771_v35 }
 0x180   :  { %718 = vmatprep.subr.bf16.mxu1 %v973_v0 }
 0x183   :  { %719 = vmatpush3.bf16.msra.mxu1 %v772_v36 }
 0x184   :  { %720 = vmatprep.subr.bf16.mxu1 %v973_v0 }
 0x187   :  { %721 = vmatpush3.bf16.msra.mxu1 %v773_v37 }
 0x188   :  { %722 = vmatprep.subr.bf16.mxu1 %v973_v0 }
 0x18b   :  { %723 = vmatpush3.bf16.msra.mxu1 %v774_v38 }
 0x18c   :  { %724 = vmatprep.subr.bf16.mxu1 %v973_v0 }
 0x18f   :  { %725 = vmatpush3.bf16.msra.mxu1 %v775_v39 }
 0x190   :  { %726 = vmatprep.subr.bf16.mxu1 %v973_v0 }
 0x193   :  { %727 = vmatpush3.bf16.msra.mxu1 %v776_v48 }
 0x194   :  { %728 = vmatprep.subr.bf16.mxu1 %v973_v0 }
 0x197   :  { %729 = vmatpush3.bf16.msra.mxu1 %v777_v49 }
 0x24d   :  { %v332_v41 = vpop.f32.mrb[0].mxu1 }
 0x24e   :  { %v333_v42 = vadd.f32 %v591_v40, %v332_v41  ;;  %v692_v43 = vpop.f32.mrb[1].mxu1 }
 0x24f   :  { %v335_v44 = vpop.f32.mrb[2].mxu1 }
 0x250   :  { %v338_v45 = vmax.f32 %v333_v42, 0.0  ;;  %v693_v46 = vpop.f32.mrb[3].mxu1 }
 0x252   :  { %v339_v47 = vpack.c.bf16 %v338_v45, %v338_v45 }
 0x254   :  { %711 = vmatmul.mubr.bf16.vlgmr.msra.gmra.mrb[4].mxu0 %v339_v47 }
 0x327   :  { %v444_v51 = vpop.f32.mrb[4].mxu0 }
 0x328   :  { %v445_v52 = vadd.f32 %v600_v50, %v444_v51  ;;  %v712_v53 = vpop.f32.mrb[5].mxu0 }
 0x329   :  { %v447_v54 = vpop.f32.mrb[6].mxu0 }
 0x32a   :  { %v450_v55 = vmax.f32 %v445_v52, 0.0  ;;  %v713_v56 = vpop.f32.mrb[7].mxu0 }
 0x32c   :  { %v451_v57 = vpack.c.bf16 %v450_v55, %v450_v55 }
 0x32e   :  { %731 = vmatmul.mubr.bf16.vlgmr.msra.gmra.mrb[4].mxu1 %v451_v57 }
 0x401   :  { %v557_v59 = vpop.f32.mrb[4].mxu1 }
 0x402   :  { %v558_v60 = vadd.f32 %v609_v58, %v557_v59  ;;  %v732_v61 = vpop.f32.mrb[5].mxu1 }
 0x403   :  { %v560_v62 = vpop.f32.mrb[6].mxu1 }
 0x404   :  { %563 = vst [vmem:[#allocation14] sm:$0xff] %v558_v60  ;;  %v733_v63 = vpop.f32.mrb[7].mxu1 }
 0x405   :  { %943 = shalt.err (!%p940_p4)
}
 0x406   :  { %s944_s3 = scalar_lea.hbm %s1168_s7, 128 }
 0x407   :  { %p945_p5 = scmp.ne.s32.totalorder %s1168_s7, %s944_s3  ;;  %p948_p6 = scmp.lt.u32.totalorder %s944_s3, %s1168_s7 }
 0x409   :  { %p950_p7 = pnand %p948_p6, %p945_p5 }
 0x40b   :  { %953 = shalt.err (!%p950_p7)
}
 0x40c   :  { %573 = dma.vmem_to_hbm [thread:$0]  %s571_s10, 128, %s1168_s7, [#allocation4]  }
 0x40d   :  { %962 = dma.done.wait [#allocation4], 128  }
 0x40e   :  { %963 = vsyncadd [#allocation4], 4294967168 }
 0x40f   :  { %577 = vsyncpa [#allocation3], 1 }
 0x410   :  { %578 = vsyncpa [#allocation6], 1 }
 0x411   :  { %579 = vsyncpa [#allocation9], 1 }
 0x412   :  { %580 = vsyncpa [#allocation12], 1 }
 0x413   :  { %581 = vsyncpa [#allocation4], 1 }

// kernel: simple_nn_forward.1
= control target key start
LH: loop header
LB: loop body
LE: loop exit
PB: predicated region body
PF: predicated region fallthrough
CT: control target
= control target key end

     0   :  { %12 = vsyncpa [#allocation3], 0  ;;  %s1161_s0 = inlined_call_operand.hbm [shape: bf16[8,128], index: 0, kind: input, shape index: {}]   ;;  %s1162_s1 = inlined_call_operand.hbm [shape: bf16[128,128], index: 1, kind: input, shape index: {}]   ;;  %s1163_s2 = inlined_call_operand.hbm [shape: f32[1,128], index: 2, kind: input, shape index: {}]   ;;  %s1164_s3 = inlined_call_operand.hbm [shape: bf16[2,128,128], index: 3, kind: input, shape index: {}]   ;;  %s1165_s4 = inlined_call_operand.hbm [shape: f32[2,128], index: 4, kind: input, shape index: {}]   ;;  %s1166_s5 = inlined_call_operand.hbm [shape: bf16[128,128], index: 5, kind: input, shape index: {}]   ;;  %s1167_s6 = inlined_call_operand.hbm [shape: f32[1,128], index: 6, kind: input, shape index: {}]   ;;  %s1168_s7 = inlined_call_operand.hbm [shape: f32[8,128], index: 7, kind: output, shape index: {}]  }
   0x1   :  { %13 = vsyncpa [#allocation6], 0 }
   0x2   :  { %14 = vsyncpa [#allocation9], 0 }
   0x3   :  { %15 = vsyncpa [#allocation12], 0 }
   0x4   :  { %16 = vsyncpa [#allocation4], 0  ;;  %s964_s24 = smov [#allocation5]   ;;  %s778_s28 = scalar_lea.hbm %s1162_s1, 1024 }
   0x5   :  { %s32_s25 = sshll.u32 %s964_s24, 4  ;;  %p779_p0 = scmp.ne.s32.totalorder %s1162_s1, %s778_s28  ;;  %s33_s25 = int_to_ptr.vmem [resolvable:$true] %s32_s25 }
   0x6   :  { %p782_p1 = scmp.lt.u32.totalorder %s778_s28, %s1162_s1 }
   0x8   :  { %p784_p2 = pnand %p782_p1, %p779_p0 }
   0xa   :  { %787 = shalt.err (!%p784_p2)
}
   0xb   :  { %s788_s10 = scalar_lea.vmem %s33_s25, 1024  ;;  %p793_p4 = scmp.lt.s32.totalorder %s33_s25, %s33_s25 }
   0xc   :  { %p789_p3 = scmp.ne.s32.totalorder %s33_s25, %s788_s10  ;;  %p794_p5 = scmp.lt.s32.totalorder %s788_s10, %s788_s10 }
   0xe   :  { %p795_p6 = por %p794_p5, %p793_p4 }
  0x10   :  { %p796_p7 = pnand %p795_p6, %p789_p3 }
  0x12   :  { %799 = shalt.err (!%p796_p7)
}
  0x13   :  { %s965_s11 = smov 64   ;;  %s966_s12 = smov 4  }
  0x14   :  { %38 = dma.hbm_to_vmem [thread:$0]  %s1162_s1, 1024, %s33_s25, [#allocation6], %s965_s11, %s965_s11, %s966_s12  }
  0x15   :  { %s967_s15 = smov [#allocation8]   ;;  %s968_s17 = smov [#allocation11]  }
  0x16   :  { %s54_s16 = sshll.u32 %s967_s15, 4  ;;  %s76_s18 = sshll.u32 %s968_s17, 4  ;;  %s55_s16 = int_to_ptr.vmem [resolvable:$true] %s54_s16  ;;  %s77_s18 = int_to_ptr.vmem [resolvable:$true] %s76_s18 }
  0x17   :  { %s800_s21 = scalar_lea.hbm %s1164_s3, 2048 }
  0x18   :  { %p801_p8 = scmp.ne.s32.totalorder %s1164_s3, %s800_s21  ;;  %p804_p9 = scmp.lt.u32.totalorder %s800_s21, %s1164_s3 }
  0x1a   :  { %p806_p10 = pnand %p804_p9, %p801_p8 }
  0x1c   :  { %809 = shalt.err (!%p806_p10)
}
  0x1d   :  { %s810_s1 = scalar_lea.vmem %s55_s16, 2048  ;;  %p815_p12 = scmp.lt.s32.totalorder %s55_s16, %s55_s16 }
  0x1e   :  { %p811_p11 = scmp.ne.s32.totalorder %s55_s16, %s810_s1  ;;  %p816_p13 = scmp.lt.s32.totalorder %s810_s1, %s810_s1 }
  0x20   :  { %p817_p0 = por %p816_p13, %p815_p12 }
  0x22   :  { %p818_p1 = pnand %p817_p0, %p811_p11 }
  0x24   :  { %821 = shalt.err (!%p818_p1)
}
  0x25   :  { %60 = dma.hbm_to_vmem [thread:$0]  %s1164_s3, 2048, %s55_s16, [#allocation9], %s965_s11, %s965_s11, %s966_s12  }
  0x26   :  { %s822_s30 = scalar_lea.hbm %s1166_s5, 1024 }
  0x27   :  { %p823_p2 = scmp.ne.s32.totalorder %s1166_s5, %s822_s30  ;;  %p826_p3 = scmp.lt.u32.totalorder %s822_s30, %s1166_s5 }
  0x29   :  { %p828_p4 = pnand %p826_p3, %p823_p2 }
  0x2b   :  { %831 = shalt.err (!%p828_p4)
}
  0x2c   :  { %s832_s14 = scalar_lea.vmem %s77_s18, 1024  ;;  %p837_p6 = scmp.lt.s32.totalorder %s77_s18, %s77_s18 }
  0x2d   :  { %p833_p5 = scmp.ne.s32.totalorder %s77_s18, %s832_s14  ;;  %p838_p7 = scmp.lt.s32.totalorder %s832_s14, %s832_s14 }
  0x2f   :  { %p839_p8 = por %p838_p7, %p837_p6 }
  0x31   :  { %p840_p9 = pnand %p839_p8, %p833_p5 }
  0x33   :  { %843 = shalt.err (!%p840_p9)
}
  0x34   :  { %82 = dma.hbm_to_vmem [thread:$0]  %s1166_s5, 1024, %s77_s18, [#allocation12], %s965_s11, %s965_s11, %s966_s12  }
  0x35   :  { %s969_s16 = smov [#allocation2]   ;;  %s970_s19 = smov [#allocation7]  }
  0x36   :  { %s23_s17 = sshll.u32 %s969_s16, 4  ;;  %s45_s20 = sshll.u32 %s970_s19, 4  ;;  %s24_s17 = int_to_ptr.vmem [resolvable:$true] %s23_s17  ;;  %s46_s20 = int_to_ptr.vmem [resolvable:$true] %s45_s20 }
  0x37   :  { %s844_s23 = scalar_lea.hbm %s1161_s0, 64 }
  0x38   :  { %p845_p10 = scmp.ne.s32.totalorder %s1161_s0, %s844_s23  ;;  %p848_p11 = scmp.lt.u32.totalorder %s844_s23, %s1161_s0 }
  0x3a   :  { %p850_p12 = pnand %p848_p11, %p845_p10 }
  0x3c   :  { %853 = shalt.err (!%p850_p12)
}
  0x3d   :  { %s854_s5 = scalar_lea.vmem %s24_s17, 64  ;;  %p859_p0 = scmp.lt.s32.totalorder %s24_s17, %s24_s17 }
  0x3e   :  { %p855_p13 = scmp.ne.s32.totalorder %s24_s17, %s854_s5  ;;  %p860_p1 = scmp.lt.s32.totalorder %s854_s5, %s854_s5 }
  0x40   :  { %p861_p2 = por %p860_p1, %p859_p0 }
  0x42   :  { %p862_p3 = pnand %p861_p2, %p855_p13 }
  0x44   :  { %865 = shalt.err (!%p862_p3)
}
  0x45   :  { %26 = dma.hbm_to_vmem [thread:$0]  %s1161_s0, 64, %s24_s17, [#allocation3]  }
  0x46   :  { %s866_s28 = scalar_lea.hbm %s1163_s2, 16 }
  0x47   :  { %p867_p4 = scmp.ne.s32.totalorder %s1163_s2, %s866_s28  ;;  %p870_p5 = scmp.lt.u32.totalorder %s866_s28, %s1163_s2 }
  0x49   :  { %p872_p6 = pnand %p870_p5, %p867_p4 }
  0x4b   :  { %875 = shalt.err (!%p872_p6)
}
  0x4c   :  { %s876_s10 = scalar_lea.vmem %s46_s20, 16  ;;  %s880_s13 = scalar_lea.vmem %s46_s20, 32 }
  0x4d   :  { %p877_p7 = scmp.ne.s32.totalorder %s46_s20, %s876_s10  ;;  %p881_p8 = scmp.lt.s32.totalorder %s46_s20, %s46_s20 }
  0x4e   :  { %p882_p9 = scmp.lt.s32.totalorder %s880_s13, %s876_s10 }
  0x50   :  { %p883_p10 = por %p882_p9, %p881_p8 }
  0x52   :  { %p884_p11 = pnand %p883_p10, %p877_p7 }
  0x54   :  { %887 = shalt.err (!%p884_p11)
}
  0x55   :  { %48 = dma.hbm_to_vmem [thread:$0]  %s1163_s2, 16, %s46_s20, [#allocation6]  }
  0x56   :  { %s971_s3 = smov [#allocation10]   ;;  %s972_s16 = smov [#allocation13]  }
  0x57   :  { %s67_s15 = sshll.u32 %s971_s3, 4  ;;  %s89_s17 = sshll.u32 %s972_s16, 4  ;;  %s68_s15 = int_to_ptr.vmem [resolvable:$true] %s67_s15  ;;  %s90_s17 = int_to_ptr.vmem [resolvable:$true] %s89_s17 }
  0x58   :  { %s888_s22 = scalar_lea.hbm %s1165_s4, 32 }
  0x59   :  { %p889_p12 = scmp.ne.s32.totalorder %s1165_s4, %s888_s22  ;;  %p892_p13 = scmp.lt.u32.totalorder %s888_s22, %s1165_s4 }
  0x5b   :  { %p894_p0 = pnand %p892_p13, %p889_p12 }
  0x5d   :  { %897 = shalt.err (!%p894_p0)
}
  0x5e   :  { %s898_s2 = scalar_lea.vmem %s68_s15, 32  ;;  %p903_p2 = scmp.lt.s32.totalorder %s68_s15, %s68_s15 }
  0x5f   :  { %p899_p1 = scmp.ne.s32.totalorder %s68_s15, %s898_s2  ;;  %p904_p3 = scmp.lt.s32.totalorder %s898_s2, %s898_s2 }
  0x61   :  { %p905_p4 = por %p904_p3, %p903_p2 }
  0x63   :  { %p906_p5 = pnand %p905_p4, %p899_p1 }
  0x65   :  { %909 = shalt.err (!%p906_p5)
}
  0x66   :  { %70 = dma.hbm_to_vmem [thread:$0]  %s1165_s4, 32, %s68_s15, [#allocation9]  }
  0x67   :  { %s910_s12 = scalar_lea.hbm %s1167_s6, 16 }
  0x68   :  { %p911_p6 = scmp.ne.s32.totalorder %s1167_s6, %s910_s12  ;;  %p914_p7 = scmp.lt.u32.totalorder %s910_s12, %s1167_s6 }
  0x6a   :  { %p916_p8 = pnand %p914_p7, %p911_p6 }
  0x6c   :  { %919 = shalt.err (!%p916_p8)
}
  0x6d   :  { %s920_s30 = scalar_lea.vmem %s90_s17, 16  ;;  %s924_s8 = scalar_lea.vmem %s90_s17, 32 }
  0x6e   :  { %p921_p9 = scmp.ne.s32.totalorder %s90_s17, %s920_s30  ;;  %p925_p10 = scmp.lt.s32.totalorder %s90_s17, %s90_s17 }
  0x6f   :  { %p926_p11 = scmp.lt.s32.totalorder %s924_s8, %s920_s30 }
  0x71   :  { %p927_p12 = por %p926_p11, %p925_p10 }
  0x73   :  { %p928_p13 = pnand %p927_p12, %p921_p9 }
  0x75   :  { %931 = shalt.err (!%p928_p13)
}
  0x76   :  { %92 = dma.hbm_to_vmem [thread:$0]  %s1167_s6, 16, %s90_s17, [#allocation12]  }
  0x77   :  { %954 = dma.done.wait [#allocation3], 64  }
  0x78   :  { %955 = vsyncadd [#allocation3], 4294967232 }
  0x79   :  { %956 = dma.done.wait [#allocation6], 1040  }
  0x7a   :  { %957 = vsyncadd [#allocation6], 4294966256 }
  0x7b   :  { %958 = dma.done.wait [#allocation9], 2080  }
  0x7c   :  { %959 = vsyncadd [#allocation9], 4294965216 }
  0x7d   :  { %960 = dma.done.wait [#allocation12], 1040  }
  0x7e   :  { %961 = vsyncadd [#allocation12], 4294966256  ;;  %v973_v0 = vmov 0.0   ;;  %vm974_vm0 = vmmov 0   ;;  %v746_v1 = vld [vmem:[#allocation5] sm:$0xff]   ;;  %v747_v2 = vld [vmem:[#allocation5 + $0x8] sm:$0xff]  }
  0x7f   :  { %654 = vmatprep.subr.bf16.mxu0 %v973_v0  ;;  %670 = vmatprep.mubr.msk.bf16.mxu0 %vm974_vm0, %v973_v0  ;;  %v748_v3 = vld [vmem:[#allocation5 + $0x10] sm:$0xff]   ;;  %v754_v4 = vld [vmem:[#allocation8] sm:$0xff]   ;;  %v749_v5 = vld [vmem:[#allocation5 + $0x18] sm:$0xff]   ;;  %s975_s6 = smov [#allocation14]  }
  0x80   :  { %674 = vmatprep.subr.bf16.mxu1 %v973_v0  ;;  %690 = vmatprep.mubr.msk.bf16.mxu1 %vm974_vm0, %v973_v0  ;;  %v755_v6 = vld [vmem:[#allocation8 + $0x8] sm:$0xff]   ;;  %v750_v7 = vld [vmem:[#allocation5 + $0x20] sm:$0xff]   ;;  %v756_v8 = vld [vmem:[#allocation8 + $0x10] sm:$0xff]   ;;  %s570_s10 = sshll.u32 %s975_s6, 4  ;;  %s571_s10 = int_to_ptr.vmem [resolvable:$true] %s570_s10 }
  0x81   :  { %655 = vmatpush3.bf16.msra.mxu0 %v746_v1  ;;  %675 = vmatpush3.bf16.msra.mxu1 %v754_v4  ;;  %v751_v9 = vld [vmem:[#allocation5 + $0x28] sm:$0xff]   ;;  %v757_v10 = vld [vmem:[#allocation8 + $0x18] sm:$0xff]   ;;  %v752_v11 = vld [vmem:[#allocation5 + $0x30] sm:$0xff]   ;;  %s932_s13 = scalar_lea.vmem %s571_s10, 128  ;;  %p937_p1 = scmp.lt.s32.totalorder %s571_s10, %s571_s10 }
  0x82   :  { %656 = vmatprep.subr.bf16.mxu0 %v973_v0  ;;  %676 = vmatprep.subr.bf16.mxu1 %v973_v0  ;;  %v758_v12 = vld [vmem:[#allocation8 + $0x20] sm:$0xff]   ;;  %v753_v13 = vld [vmem:[#allocation5 + $0x38] sm:$0xff]   ;;  %v759_v14 = vld [vmem:[#allocation8 + $0x28] sm:$0xff]   ;;  %p933_p0 = scmp.ne.s32.totalorder %s571_s10, %s932_s13  ;;  %p938_p2 = scmp.lt.s32.totalorder %s932_s13, %s932_s13 }
  0x83   :  { %v115_v15 = vld [vmem:[#allocation2] sm:$0xf]  ;;  %v760_v16 = vld [vmem:[#allocation8 + $0x30] sm:$0xff]   ;;  %v762_v18 = vld [vmem:[#allocation8 + $0x40] sm:$0xff]  }
  0x84   :  { %v761_v17 = vld [vmem:[#allocation8 + $0x38] sm:$0xff]   ;;  %v763_v19 = vld [vmem:[#allocation8 + $0x48] sm:$0xff]   ;;  %v764_v20 = vld [vmem:[#allocation8 + $0x50] sm:$0xff]   ;;  %p939_p3 = por %p938_p2, %p937_p1 }
  0x85   :  { %657 = vmatpush3.bf16.msra.mxu0 %v747_v2  ;;  %677 = vmatpush3.bf16.msra.mxu1 %v755_v6  ;;  %v765_v21 = vld [vmem:[#allocation8 + $0x58] sm:$0xff]   ;;  %v766_v22 = vld [vmem:[#allocation8 + $0x60] sm:$0xff]   ;;  %v767_v23 = vld [vmem:[#allocation8 + $0x68] sm:$0xff]  }
  0x86   :  { %658 = vmatprep.subr.bf16.mxu0 %v973_v0  ;;  %678 = vmatprep.subr.bf16.mxu1 %v973_v0  ;;  %v582_v24 = vld [vmem:[#allocation7] ss:$0 sm:$0xff]  ;;  %v768_v32 = vld [vmem:[#allocation8 + $0x70] sm:$0xff]   ;;  %v770_v34 = vld [vmem:[#allocation11] sm:$0xff]   ;;  %p940_p4 = pnand %p939_p3, %p933_p0 }
  0x87   :  { %v769_v33 = vld [vmem:[#allocation8 + $0x78] sm:$0xff]   ;;  %v771_v35 = vld [vmem:[#allocation11 + $0x8] sm:$0xff]   ;;  %v774_v38 = vld [vmem:[#allocation11 + $0x20] sm:$0xff]  }
  0x88   :  { %v772_v36 = vld [vmem:[#allocation11 + $0x10] sm:$0xff]   ;;  %v773_v37 = vld [vmem:[#allocation11 + $0x18] sm:$0xff]   ;;  %v775_v39 = vld [vmem:[#allocation11 + $0x28] sm:$0xff]  }
  0x89   :  { %659 = vmatpush3.bf16.msra.mxu0 %v748_v3  ;;  %679 = vmatpush3.bf16.msra.mxu1 %v756_v8  ;;  %v591_v40 = vld [vmem:[#allocation10] ss:$0 sm:$0xff]  ;;  %v776_v48 = vld [vmem:[#allocation11 + $0x30] sm:$0xff]   ;;  %v600_v50 = vld [vmem:[#allocation10 + $0x1] ss:$0 sm:$0xff] }
  0x8a   :  { %660 = vmatprep.subr.bf16.mxu0 %v973_v0  ;;  %680 = vmatprep.subr.bf16.mxu1 %v973_v0  ;;  %v777_v49 = vld [vmem:[#allocation11 + $0x38] sm:$0xff]   ;;  %v609_v58 = vld [vmem:[#allocation13] ss:$0 sm:$0xff] }
  0x8d   :  { %661 = vmatpush3.bf16.msra.mxu0 %v749_v5  ;;  %681 = vmatpush3.bf16.msra.mxu1 %v757_v10 }
  0x8e   :  { %662 = vmatprep.subr.bf16.mxu0 %v973_v0  ;;  %682 = vmatprep.subr.bf16.mxu1 %v973_v0 }
  0x91   :  { %663 = vmatpush3.bf16.msra.mxu0 %v750_v7  ;;  %683 = vmatpush3.bf16.msra.mxu1 %v758_v12 }
  0x92   :  { %664 = vmatprep.subr.bf16.mxu0 %v973_v0  ;;  %684 = vmatprep.subr.bf16.mxu1 %v973_v0 }
  0x95   :  { %665 = vmatpush3.bf16.msra.mxu0 %v751_v9  ;;  %685 = vmatpush3.bf16.msra.mxu1 %v759_v14 }
  0x96   :  { %666 = vmatprep.subr.bf16.mxu0 %v973_v0  ;;  %686 = vmatprep.subr.bf16.mxu1 %v973_v0 }
  0x99   :  { %667 = vmatpush3.bf16.msra.mxu0 %v752_v11  ;;  %687 = vmatpush3.bf16.msra.mxu1 %v760_v16 }
  0x9a   :  { %668 = vmatprep.subr.bf16.mxu0 %v973_v0  ;;  %688 = vmatprep.subr.bf16.mxu1 %v973_v0 }
  0x9d   :  { %669 = vmatpush3.bf16.msra.mxu0 %v753_v13  ;;  %689 = vmatpush3.bf16.msra.mxu1 %v761_v17 }
  0x9e   :  { %694 = vmatprep.subr.bf16.mxu0 %v973_v0  ;;  %714 = vmatprep.subr.bf16.mxu1 %v973_v0 }
  0xa0   :  { %671 = vmatmul.mubr.bf16.vlgmr.msra.gmra.mrb[0].mxu0 %v115_v15 }
  0xa1   :  { %710 = vmatprep.mubr.msk.bf16.mxu0 %vm974_vm0, %v973_v0  ;;  %695 = vmatpush3.bf16.msra.mxu0 %v762_v18 }
  0xa2   :  { %696 = vmatprep.subr.bf16.mxu0 %v973_v0 }
  0xa5   :  { %697 = vmatpush3.bf16.msra.mxu0 %v763_v19 }
  0xa6   :  { %698 = vmatprep.subr.bf16.mxu0 %v973_v0 }
  0xa9   :  { %699 = vmatpush3.bf16.msra.mxu0 %v764_v20 }
  0xaa   :  { %700 = vmatprep.subr.bf16.mxu0 %v973_v0 }
  0xad   :  { %701 = vmatpush3.bf16.msra.mxu0 %v765_v21 }
  0xae   :  { %702 = vmatprep.subr.bf16.mxu0 %v973_v0 }
  0xb1   :  { %703 = vmatpush3.bf16.msra.mxu0 %v766_v22 }
  0xb2   :  { %704 = vmatprep.subr.bf16.mxu0 %v973_v0 }
  0xb5   :  { %705 = vmatpush3.bf16.msra.mxu0 %v767_v23 }
  0xb6   :  { %706 = vmatprep.subr.bf16.mxu0 %v973_v0 }
  0xb9   :  { %707 = vmatpush3.bf16.msra.mxu0 %v768_v32 }
  0xba   :  { %708 = vmatprep.subr.bf16.mxu0 %v973_v0 }
  0xbd   :  { %709 = vmatpush3.bf16.msra.mxu0 %v769_v33 }
 0x173   :  { %v221_v25 = vpop.f32.mrb[0].mxu0 }
 0x174   :  { %v222_v26 = vadd.f32 %v582_v24, %v221_v25  ;;  %v672_v27 = vpop.f32.mrb[1].mxu0 }
 0x175   :  { %v224_v28 = vpop.f32.mrb[2].mxu0 }
 0x176   :  { %v227_v29 = vmax.f32 %v222_v26, 0.0  ;;  %v673_v30 = vpop.f32.mrb[3].mxu0 }
 0x178   :  { %v228_v31 = vpack.c.bf16 %v227_v29, %v227_v29 }
 0x17a   :  { %691 = vmatmul.mubr.bf16.vlgmr.msra.gmra.mrb[0].mxu1 %v228_v31 }
 0x17b   :  { %730 = vmatprep.mubr.msk.bf16.mxu1 %vm974_vm0, %v973_v0  ;;  %715 = vmatpush3.bf16.msra.mxu1 %v770_v34 }
 0x17c   :  { %716 = vmatprep.subr.bf16.mxu1 %v973_v0 }
 0x17f   :  { %717 = vmatpush3.bf16.msra.mxu1 %v771_v35 }
 0x180   :  { %718 = vmatprep.subr.bf16.mxu1 %v973_v0 }
 0x183   :  { %719 = vmatpush3.bf16.msra.mxu1 %v772_v36 }
 0x184   :  { %720 = vmatprep.subr.bf16.mxu1 %v973_v0 }
 0x187   :  { %721 = vmatpush3.bf16.msra.mxu1 %v773_v37 }
 0x188   :  { %722 = vmatprep.subr.bf16.mxu1 %v973_v0 }
 0x18b   :  { %723 = vmatpush3.bf16.msra.mxu1 %v774_v38 }
 0x18c   :  { %724 = vmatprep.subr.bf16.mxu1 %v973_v0 }
 0x18f   :  { %725 = vmatpush3.bf16.msra.mxu1 %v775_v39 }
 0x190   :  { %726 = vmatprep.subr.bf16.mxu1 %v973_v0 }
 0x193   :  { %727 = vmatpush3.bf16.msra.mxu1 %v776_v48 }
 0x194   :  { %728 = vmatprep.subr.bf16.mxu1 %v973_v0 }
 0x197   :  { %729 = vmatpush3.bf16.msra.mxu1 %v777_v49 }
 0x24d   :  { %v332_v41 = vpop.f32.mrb[0].mxu1 }
 0x24e   :  { %v333_v42 = vadd.f32 %v591_v40, %v332_v41  ;;  %v692_v43 = vpop.f32.mrb[1].mxu1 }
 0x24f   :  { %v335_v44 = vpop.f32.mrb[2].mxu1 }
 0x250   :  { %v338_v45 = vmax.f32 %v333_v42, 0.0  ;;  %v693_v46 = vpop.f32.mrb[3].mxu1 }
 0x252   :  { %v339_v47 = vpack.c.bf16 %v338_v45, %v338_v45 }
 0x254   :  { %711 = vmatmul.mubr.bf16.vlgmr.msra.gmra.mrb[4].mxu0 %v339_v47 }
 0x327   :  { %v444_v51 = vpop.f32.mrb[4].mxu0 }
 0x328   :  { %v445_v52 = vadd.f32 %v600_v50, %v444_v51  ;;  %v712_v53 = vpop.f32.mrb[5].mxu0 }
 0x329   :  { %v447_v54 = vpop.f32.mrb[6].mxu0 }
 0x32a   :  { %v450_v55 = vmax.f32 %v445_v52, 0.0  ;;  %v713_v56 = vpop.f32.mrb[7].mxu0 }
 0x32c   :  { %v451_v57 = vpack.c.bf16 %v450_v55, %v450_v55 }
 0x32e   :  { %731 = vmatmul.mubr.bf16.vlgmr.msra.gmra.mrb[4].mxu1 %v451_v57 }
 0x401   :  { %v557_v59 = vpop.f32.mrb[4].mxu1 }
 0x402   :  { %v558_v60 = vadd.f32 %v609_v58, %v557_v59  ;;  %v732_v61 = vpop.f32.mrb[5].mxu1 }
 0x403   :  { %v560_v62 = vpop.f32.mrb[6].mxu1 }
 0x404   :  { %563 = vst [vmem:[#allocation14] sm:$0xff] %v558_v60  ;;  %v733_v63 = vpop.f32.mrb[7].mxu1 }
 0x405   :  { %943 = shalt.err (!%p940_p4)
}
 0x406   :  { %s944_s3 = scalar_lea.hbm %s1168_s7, 128 }
 0x407   :  { %p945_p5 = scmp.ne.s32.totalorder %s1168_s7, %s944_s3  ;;  %p948_p6 = scmp.lt.u32.totalorder %s944_s3, %s1168_s7 }
 0x409   :  { %p950_p7 = pnand %p948_p6, %p945_p5 }
 0x40b   :  { %953 = shalt.err (!%p950_p7)
}
 0x40c   :  { %573 = dma.vmem_to_hbm [thread:$0]  %s571_s10, 128, %s1168_s7, [#allocation4]  }
 0x40d   :  { %962 = dma.done.wait [#allocation4], 128  }
 0x40e   :  { %963 = vsyncadd [#allocation4], 4294967168 }
 0x40f   :  { %577 = vsyncpa [#allocation3], 1 }
 0x410   :  { %578 = vsyncpa [#allocation6], 1 }
 0x411   :  { %579 = vsyncpa [#allocation9], 1 }
 0x412   :  { %580 = vsyncpa [#allocation12], 1 }
 0x413   :  { %581 = vsyncpa [#allocation4], 1 }

</bundles_post_ra>
